<compile_context>
chip_gen: v7x
topology: tpu7x:2x2x1
jax: 0.10.0
libtpu: 0.0.40
codegen_flags: <defaults>
</compile_context>

<pallas_src>
from functools import partial

import jax
import jax.numpy as jnp
from jax.experimental import pallas as pl
from jax.experimental.pallas import tpu as pltpu


def _panoptic_loss_kernel(flags_ref,                       # SMEM int32[2] (scalar prefetch)
                          pc_ref, tc_ref, po_ref, to_ref,  # VMEM tiles (1, C, hb, W)
                          out_ref,                         # SMEM f32[1]
                          acc_c_ref, acc_o_ref,            # VMEM f32 block accumulators
                          *, weight, center_weight, offset_weight,
                          n_center, n_offset, h_total, h_block, has_tail):
    b = pl.program_id(0)
    h = pl.program_id(1)
    is_last = (b == pl.num_programs(0) - 1) & (h == pl.num_programs(1) - 1)

    @pl.when((b == 0) & (h == 0))
    def _init():
        acc_c_ref[...] = jnp.zeros_like(acc_c_ref)
        acc_o_ref[...] = jnp.zeros_like(acc_o_ref)

    # Upcast after load so bf16 activations can stay bf16 in HBM (half the DMA bytes).
    d_c = pc_ref[...].astype(jnp.float32) - tc_ref[...].astype(jnp.float32)
    d_o = po_ref[...].astype(jnp.float32) - to_ref[...].astype(jnp.float32)
    sq = d_c * d_c
    ab = jnp.abs(d_o)

    if has_tail:
        # Last H-block extends past H: out-of-bounds rows hold garbage, zero them.
        rows = jax.lax.broadcasted_iota(jnp.int32, (1, 1, h_block, sq.shape[-1]), 2)
        valid = (h * h_block + rows) < h_total
        sq = jnp.where(valid, sq, 0.0)
        ab = jnp.where(valid, ab, 0.0)   # broadcasts over the offset channel dim

    # VPU-only accumulation in the inner loop (no per-tile XLU / scalar work).
    acc_c_ref[...] += sq
    acc_o_ref[...] += ab

    @pl.when(is_last)
    def _finalize():
        ssq = jnp.sum(acc_c_ref[...])
        sab = jnp.sum(acc_o_ref[...])
        c_term = jnp.where(flags_ref[0] > 0, (center_weight / n_center) * ssq, 0.0)
        o_term = jnp.where(flags_ref[1] > 0, (offset_weight / n_offset) * sab, 0.0)
        out_ref[0] = (weight * (c_term + o_term)).astype(jnp.float32)


def _pick_h_block(H, W, c_center, c_offset, itemsize, target_bytes):
    """Rows-of-H per block so the 4 streamed tiles total ~target_bytes per step.

    With double-buffering plus the two block-shaped accumulators this stays well
    under v7x's 32 MiB default-scoped / 64 MiB physical VMEM (and v5e's 16 MiB).
    """
    per_row = 2 * (c_center + c_offset) * W * itemsize
    hb = (target_bytes // max(per_row, 1)) // 8 * 8
    hb = int(max(8, hb))
    return H if hb >= H else hb


def deeplab_panoptic_loss(predictions, targets, *, weight=1.0,
                          center_weight=200.0, offset_weight=0.1,
                          h_block=None, target_block_bytes=2 << 20):
    pc, tc = predictions['center'], targets['center']
    po, to = predictions['offset'], targets['offset']
    assert pc.shape == tc.shape and po.shape == to.shape
    B, Cc, H, W = pc.shape
    Bo, Co, Ho, Wo = po.shape
    assert (B, H, W) == (Bo, Ho, Wo)

    # Only the predicate mask.sum() > 0 matters (the masked term cancels to the
    # plain mean loss), so the mask arrays are never streamed through the kernel.
    if 'center_mask' in targets:
        c_flag = (jnp.sum(targets['center_mask'].astype(jnp.float32)) > 0).astype(jnp.int32)
    else:
        c_flag = jnp.array(1, jnp.int32)
    if 'offset_mask' in targets:
        o_flag = (jnp.sum(targets['offset_mask'].astype(jnp.float32)) > 0).astype(jnp.int32)
    else:
        o_flag = jnp.array(1, jnp.int32)
    flags = jnp.stack([c_flag, o_flag]).astype(jnp.int32)

    itemsize = max(jnp.dtype(pc.dtype).itemsize, jnp.dtype(po.dtype).itemsize)
    if h_block is None:
        hb = _pick_h_block(H, W, Cc, Co, itemsize, target_block_bytes)
    else:
        hb = int(h_block)
        if hb < H:
            hb = -(-hb // 8) * 8            # block H-dim must be a multiple of 8
        if hb >= H:
            hb = H                          # or equal to the full dim
    n_h = -(-H // hb)
    has_tail = (H % hb) != 0

    kernel = partial(
        _panoptic_loss_kernel,
        weight=float(weight),
        center_weight=float(center_weight),
        offset_weight=float(offset_weight),
        n_center=float(pc.size),
        n_offset=float(po.size),
        h_total=int(H),
        h_block=int(hb),
        has_tail=bool(has_tail),
    )

    # Native NCHW blocking: (1, C, hb, W) tiles; last dim = full W (always legal),
    # H-dim tiled in multiples of 8 with in-kernel masking for the tail block.
    c_spec = pl.BlockSpec((1, Cc, hb, W), lambda b, h, flags_ref: (b, 0, h, 0))
    o_spec = pl.BlockSpec((1, Co, hb, W), lambda b, h, flags_ref: (b, 0, h, 0))

    grid_spec = pltpu.PrefetchScalarGridSpec(
        num_scalar_prefetch=1,
        grid=(B, n_h),
        in_specs=[c_spec, c_spec, o_spec, o_spec],
        out_specs=pl.BlockSpec(memory_space=pltpu.MemorySpace.SMEM),
        scratch_shapes=[
            pltpu.VMEM((1, Cc, hb, W), jnp.float32),
            pltpu.VMEM((1, Co, hb, W), jnp.float32),
        ],
    )

    out = pl.pallas_call(
        kernel,
        out_shape=jax.ShapeDtypeStruct((1,), jnp.float32),
        grid_spec=grid_spec,
        compiler_params=pltpu.CompilerParams(
            dimension_semantics=("arbitrary", "arbitrary"),
            vmem_limit_bytes=32 * 1024 * 1024,
        ),
    )(flags, pc, tc, po, to)
    return out[0]


def _reference_loss(predictions, targets, *, weight=1.0,
                    center_weight=200.0, offset_weight=0.1):
    """Pure-JAX mirror of the PyTorch forward, for verification."""
    pc, tc = predictions['center'], targets['center']
    po, to = predictions['offset'], targets['offset']
    loss = jnp.float32(0.0)
    mse = jnp.mean((pc.astype(jnp.float32) - tc.astype(jnp.float32)) ** 2)
    if 'center_mask' in targets:
        cm = jnp.broadcast_to(
            targets['center_mask'][:, None, :, :].astype(jnp.float32), pc.shape)
        loss = loss + jnp.where(cm.sum() > 0,
                                center_weight * (mse * cm).sum() / cm.sum(), 0.0)
    else:
        loss = loss + center_weight * mse
    l1 = jnp.mean(jnp.abs(po.astype(jnp.float32) - to.astype(jnp.float32)))
    if 'offset_mask' in targets:
        om = jnp.broadcast_to(
            targets['offset_mask'][:, None, :, :].astype(jnp.float32), po.shape)
        loss = loss + jnp.where(om.sum() > 0,
                                offset_weight * (l1 * om).sum() / om.sum(), 0.0)
    else:
        loss = loss + offset_weight * l1
    return weight * loss


if __name__ == "__main__":
    key = jax.random.PRNGKey(0)
    ks = jax.random.split(key, 12)

    # Case 1: masks present, single H-block per batch element.
    B, H, W = 2, 16, 16
    preds1 = {'center': jax.random.normal(ks[0], (B, 1, H, W), jnp.float32),
              'offset': jax.random.normal(ks[1], (B, 2, H, W), jnp.float32)}
    tgts1 = {'center': jax.random.normal(ks[2], (B, 1, H, W), jnp.float32),
             'offset': jax.random.normal(ks[3], (B, 2, H, W), jnp.float32),
             'center_mask': (jax.random.uniform(ks[4], (B, H, W)) > 0.5).astype(jnp.float32),
             'offset_mask': (jax.random.uniform(ks[5], (B, H, W)) > 0.5).astype(jnp.float32)}
    got = jax.block_until_ready(deeplab_panoptic_loss(preds1, tgts1))
    ref = jax.block_until_ready(_reference_loss(preds1, tgts1))
    assert jnp.allclose(got, ref, rtol=1e-4, atol=1e-5), (got, ref)

    # Case 2: tiled H with a partial tail block, all-zero offset mask, custom weights.
    B, H, W = 2, 24, 128
    preds2 = {'center': jax.random.normal(ks[6], (B, 1, H, W), jnp.float32),
              'offset': jax.random.normal(ks[7], (B, 2, H, W), jnp.float32)}
    tgts2 = {'center': jax.random.normal(ks[8], (B, 1, H, W), jnp.float32),
             'offset': jax.random.normal(ks[9], (B, 2, H, W), jnp.float32),
             'center_mask': (jax.random.uniform(ks[10], (B, H, W)) > 0.3).astype(jnp.float32),
             'offset_mask': jnp.zeros((B, H, W), jnp.float32)}
    kw = dict(weight=0.5, center_weight=100.0, offset_weight=0.25)
    got = jax.block_until_ready(deeplab_panoptic_loss(preds2, tgts2, h_block=16, **kw))
    ref = jax.block_until_ready(_reference_loss(preds2, tgts2, **kw))
    assert jnp.allclose(got, ref, rtol=1e-4, atol=1e-5), (got, ref)

    # Case 3: no masks in targets (unconditional branch).
    B, H, W = 3, 16, 16
    preds3 = {'center': jax.random.normal(ks[11], (B, 1, H, W), jnp.float32),
              'offset': jax.random.normal(ks[0], (B, 2, H, W), jnp.float32)}
    tgts3 = {'center': jax.random.normal(ks[1], (B, 1, H, W), jnp.float32),
             'offset': jax.random.normal(ks[2], (B, 2, H, W), jnp.float32)}
    got = jax.block_until_ready(deeplab_panoptic_loss(preds3, tgts3))
    ref = jax.block_until_ready(_reference_loss(preds3, tgts3))
    assert jnp.allclose(got, ref, rtol=1e-4, atol=1e-5), (got, ref)

    print("KERNEL_OK")
</pallas_src>

<mosaic_0001>
module attributes {stable_mosaic.version = 11 : i64} {
  func.func @_panoptic_loss_kernel(%arg0: i32, %arg1: i32, %arg2: memref<2xi32, #tpu.memory_space<smem>>, %arg3: memref<1x1x16x16xf32, #tpu.memory_space<vmem>>, %arg4: memref<1x1x16x16xf32, #tpu.memory_space<vmem>>, %arg5: memref<1x2x16x16xf32, #tpu.memory_space<vmem>>, %arg6: memref<1x2x16x16xf32, #tpu.memory_space<vmem>>, %arg7: memref<1xf32, #tpu.memory_space<smem>>, %arg8: memref<1x1x16x16xf32, #tpu.memory_space<vmem>>, %arg9: memref<1x2x16x16xf32, #tpu.memory_space<vmem>>) attributes {dimension_semantics = [#tpu.dimension_semantics<arbitrary>, #tpu.dimension_semantics<arbitrary>], iteration_bounds = array<i64: 2, 1>, scalar_prefetch = 1 : i64, scratch_operands = 2 : i64, tpu.core_type = #tpu.core_type<tc>, window_params = [{transform_indices = @transform_0, window_bounds = array<i64: 1, 1, 16, 16>}, {transform_indices = @transform_1, window_bounds = array<i64: 1, 1, 16, 16>}, {transform_indices = @transform_2, window_bounds = array<i64: 1, 2, 16, 16>}, {transform_indices = @transform_3, window_bounds = array<i64: 1, 2, 16, 16>}, {transform_indices = @transform_4, window_bounds = array<i64: 1>}]} {
    %c1_i32 = arith.constant 1 : i32
    %0 = arith.cmpi eq, %arg0, %c1_i32 : i32
    %c0_i32 = arith.constant 0 : i32
    %1 = arith.cmpi eq, %arg1, %c0_i32 : i32
    %2 = arith.andi %0, %1 : i1
    %c0_i32_0 = arith.constant 0 : i32
    %3 = arith.cmpi eq, %arg0, %c0_i32_0 : i32
    %c0_i32_1 = arith.constant 0 : i32
    %4 = arith.cmpi eq, %arg1, %c0_i32_1 : i32
    %5 = arith.andi %3, %4 : i1
    %6 = arith.extui %5 : i1 to i32
    %c0_i32_2 = arith.constant 0 : i32
    %7 = arith.cmpi ne, %6, %c0_i32_2 : i32
    scf.if %7 {
      %cst = arith.constant 0.000000e+00 : f32
      %24 = vector.broadcast %cst : f32 to vector<1x1x16x16xf32>
      %c0_35 = arith.constant 0 : index
      %c0_36 = arith.constant 0 : index
      %c0_37 = arith.constant 0 : index
      %c0_38 = arith.constant 0 : index
      %25 = vector.load %arg8[%c0_35, %c0_36, %c0_37, %c0_38] : memref<1x1x16x16xf32, #tpu.memory_space<vmem>>, vector<1x1x16x16xf32>
      tpu.vector_store %arg8[%c0_35, %c0_36, %c0_37, %c0_38], %24 {strides = array<i32>} : memref<1x1x16x16xf32, #tpu.memory_space<vmem>>, vector<1x1x16x16xf32>,
      %cst_39 = arith.constant 0.000000e+00 : f32
      %26 = vector.broadcast %cst_39 : f32 to vector<1x2x16x16xf32>
      %c0_40 = arith.constant 0 : index
      %c0_41 = arith.constant 0 : index
      %c0_42 = arith.constant 0 : index
      %c0_43 = arith.constant 0 : index
      %27 = vector.load %arg9[%c0_40, %c0_41, %c0_42, %c0_43] : memref<1x2x16x16xf32, #tpu.memory_space<vmem>>, vector<1x2x16x16xf32>
      tpu.vector_store %arg9[%c0_40, %c0_41, %c0_42, %c0_43], %26 {strides = array<i32>} : memref<1x2x16x16xf32, #tpu.memory_space<vmem>>, vector<1x2x16x16xf32>,
    } else {
    }
    %c0 = arith.constant 0 : index
    %c0_3 = arith.constant 0 : index
    %c0_4 = arith.constant 0 : index
    %c0_5 = arith.constant 0 : index
    %8 = vector.load %arg3[%c0, %c0_3, %c0_4, %c0_5] : memref<1x1x16x16xf32, #tpu.memory_space<vmem>>, vector<1x1x16x16xf32>
    %c0_6 = arith.constant 0 : index
    %c0_7 = arith.constant 0 : index
    %c0_8 = arith.constant 0 : index
    %c0_9 = arith.constant 0 : index
    %9 = vector.load %arg4[%c0_6, %c0_7, %c0_8, %c0_9] : memref<1x1x16x16xf32, #tpu.memory_space<vmem>>, vector<1x1x16x16xf32>
    %10 = arith.subf %8, %9 : vector<1x1x16x16xf32>
    %c0_10 = arith.constant 0 : index
    %c0_11 = arith.constant 0 : index
    %c0_12 = arith.constant 0 : index
    %c0_13 = arith.constant 0 : index
    %11 = vector.load %arg5[%c0_10, %c0_11, %c0_12, %c0_13] : memref<1x2x16x16xf32, #tpu.memory_space<vmem>>, vector<1x2x16x16xf32>
    %c0_14 = arith.constant 0 : index
    %c0_15 = arith.constant 0 : index
    %c0_16 = arith.constant 0 : index
    %c0_17 = arith.constant 0 : index
    %12 = vector.load %arg6[%c0_14, %c0_15, %c0_16, %c0_17] : memref<1x2x16x16xf32, #tpu.memory_space<vmem>>, vector<1x2x16x16xf32>
    %13 = arith.subf %11, %12 : vector<1x2x16x16xf32>
    %14 = arith.mulf %10, %10 : vector<1x1x16x16xf32>
    %15 = math.absf %13 : vector<1x2x16x16xf32>
    %c0_18 = arith.constant 0 : index
    %c0_19 = arith.constant 0 : index
    %c0_20 = arith.constant 0 : index
    %c0_21 = arith.constant 0 : index
    %16 = vector.load %arg8[%c0_18, %c0_19, %c0_20, %c0_21] : memref<1x1x16x16xf32, #tpu.memory_space<vmem>>, vector<1x1x16x16xf32>
    %17 = arith.addf %16, %14 : vector<1x1x16x16xf32>
    %c0_22 = arith.constant 0 : index
    %c0_23 = arith.constant 0 : index
    %c0_24 = arith.constant 0 : index
    %c0_25 = arith.constant 0 : index
    %18 = vector.load %arg8[%c0_22, %c0_23, %c0_24, %c0_25] : memref<1x1x16x16xf32, #tpu.memory_space<vmem>>, vector<1x1x16x16xf32>
    tpu.vector_store %arg8[%c0_22, %c0_23, %c0_24, %c0_25], %17 {strides = array<i32>} : memref<1x1x16x16xf32, #tpu.memory_space<vmem>>, vector<1x1x16x16xf32>,
    %c0_26 = arith.constant 0 : index
    %c0_27 = arith.constant 0 : index
    %c0_28 = arith.constant 0 : index
    %c0_29 = arith.constant 0 : index
    %19 = vector.load %arg9[%c0_26, %c0_27, %c0_28, %c0_29] : memref<1x2x16x16xf32, #tpu.memory_space<vmem>>, vector<1x2x16x16xf32>
    %20 = arith.addf %19, %15 : vector<1x2x16x16xf32>
    %c0_30 = arith.constant 0 : index
    %c0_31 = arith.constant 0 : index
    %c0_32 = arith.constant 0 : index
    %c0_33 = arith.constant 0 : index
    %21 = vector.load %arg9[%c0_30, %c0_31, %c0_32, %c0_33] : memref<1x2x16x16xf32, #tpu.memory_space<vmem>>, vector<1x2x16x16xf32>
    tpu.vector_store %arg9[%c0_30, %c0_31, %c0_32, %c0_33], %20 {strides = array<i32>} : memref<1x2x16x16xf32, #tpu.memory_space<vmem>>, vector<1x2x16x16xf32>,
    %22 = arith.extui %2 : i1 to i32
    %c0_i32_34 = arith.constant 0 : i32
    %23 = arith.cmpi ne, %22, %c0_i32_34 : i32
    scf.if %23 {
      %c0_35 = arith.constant 0 : index
      %c0_36 = arith.constant 0 : index
      %c0_37 = arith.constant 0 : index
      %c0_38 = arith.constant 0 : index
      %24 = vector.load %arg8[%c0_35, %c0_36, %c0_37, %c0_38] : memref<1x1x16x16xf32, #tpu.memory_space<vmem>>, vector<1x1x16x16xf32>
      %25 = vector.shape_cast %24 : vector<1x1x16x16xf32> to vector<1x1x1x16x16xf32>
      %cst = arith.constant dense<0.000000e+00> : vector<1xf32>
      %26 = vector.multi_reduction <add>, %25, %cst [1, 2, 3, 4] : vector<1x1x1x16x16xf32> to vector<1xf32>
      %27 = vector.shape_cast %26 : vector<1xf32> to vector<1x1x1x1x1xf32>
      %28 = vector.extract %27[0, 0, 0, 0, 0] : f32 from vector<1x1x1x1x1xf32>
      %c0_39 = arith.constant 0 : index
      %c0_40 = arith.constant 0 : index
      %c0_41 = arith.constant 0 : index
      %c0_42 = arith.constant 0 : index
      %29 = vector.load %arg9[%c0_39, %c0_40, %c0_41, %c0_42] : memref<1x2x16x16xf32, #tpu.memory_space<vmem>>, vector<1x2x16x16xf32>
      %30 = vector.shape_cast %29 : vector<1x2x16x16xf32> to vector<1x1x2x16x16xf32>
      %cst_43 = arith.constant dense<0.000000e+00> : vector<1xf32>
      %31 = vector.multi_reduction <add>, %30, %cst_43 [1, 2, 3, 4] : vector<1x1x2x16x16xf32> to vector<1xf32>
      %32 = vector.shape_cast %31 : vector<1xf32> to vector<1x1x1x1x1xf32>
      %33 = vector.extract %32[0, 0, 0, 0, 0] : f32 from vector<1x1x1x1x1xf32>
      %c0_44 = arith.constant 0 : index
      %34 = memref.load %arg2[%c0_44] : memref<2xi32, #tpu.memory_space<smem>>
      %c0_i32_45 = arith.constant 0 : i32
      %35 = arith.cmpi sgt, %34, %c0_i32_45 : i32
      %cst_46 = arith.constant 3.906250e-01 : f32
      %36 = arith.mulf %cst_46, %28 : f32
      %cst_47 = arith.constant 0.000000e+00 : f32
      %37 = arith.select %35, %36, %cst_47 : f32
      %c1 = arith.constant 1 : index
      %38 = memref.load %arg2[%c1] : memref<2xi32, #tpu.memory_space<smem>>
      %c0_i32_48 = arith.constant 0 : i32
      %39 = arith.cmpi sgt, %38, %c0_i32_48 : i32
      %cst_49 = arith.constant 9.76562514E-5 : f32
      %40 = arith.mulf %cst_49, %33 : f32
      %cst_50 = arith.constant 0.000000e+00 : f32
      %41 = arith.select %39, %40, %cst_50 : f32
      %42 = arith.addf %37, %41 : f32
      %cst_51 = arith.constant 1.000000e+00 : f32
      %43 = arith.mulf %cst_51, %42 : f32
      %c0_52 = arith.constant 0 : index
      %44 = memref.load %arg7[%c0_52] : memref<1xf32, #tpu.memory_space<smem>>
      memref.store %43, %arg7[%c0_52] : memref<1xf32, #tpu.memory_space<smem>>
    } else {
    }
    return
  }
  func.func @transform_0(%arg0: i32, %arg1: i32, %arg2: memref<2xi32, #tpu.memory_space<smem>>) -> (i32, i32, i32, i32) {
    %c0_i32 = arith.constant 0 : i32
    %c0_i32_0 = arith.constant 0 : i32
    %c0_i32_1 = arith.constant 0 : i32
    return %arg0, %c0_i32, %arg1, %c0_i32_0 : i32, i32, i32, i32
  }
  func.func @transform_1(%arg0: i32, %arg1: i32, %arg2: memref<2xi32, #tpu.memory_space<smem>>) -> (i32, i32, i32, i32) {
    %c0_i32 = arith.constant 0 : i32
    %c0_i32_0 = arith.constant 0 : i32
    %c0_i32_1 = arith.constant 0 : i32
    return %arg0, %c0_i32, %arg1, %c0_i32_0 : i32, i32, i32, i32
  }
  func.func @transform_2(%arg0: i32, %arg1: i32, %arg2: memref<2xi32, #tpu.memory_space<smem>>) -> (i32, i32, i32, i32) {
    %c0_i32 = arith.constant 0 : i32
    %c0_i32_0 = arith.constant 0 : i32
    %c0_i32_1 = arith.constant 0 : i32
    return %arg0, %c0_i32, %arg1, %c0_i32_0 : i32, i32, i32, i32
  }
  func.func @transform_3(%arg0: i32, %arg1: i32, %arg2: memref<2xi32, #tpu.memory_space<smem>>) -> (i32, i32, i32, i32) {
    %c0_i32 = arith.constant 0 : i32
    %c0_i32_0 = arith.constant 0 : i32
    %c0_i32_1 = arith.constant 0 : i32
    return %arg0, %c0_i32, %arg1, %c0_i32_0 : i32, i32, i32, i32
  }
  func.func @transform_4(%arg0: i32, %arg1: i32, %arg2: memref<2xi32, #tpu.memory_space<smem>>) -> i32 {
    %c0_i32 = arith.constant 0 : i32
    %c0_i32_0 = arith.constant 0 : i32
    return %c0_i32 : i32
  }
}

</mosaic_0001>

<bundles_post_ra>
// kernel: tpu_custom_call.1
= control target key start
LH: loop header
LB: loop body
LE: loop exit
PB: predicated region body
PF: predicated region fallthrough
CT: control target
= control target key end

     0   :  { %s1285_s0 = inlined_call_operand.hbm [shape: s32[2], index: 0, kind: input, shape index: {}]   ;;  %s1286_s1 = inlined_call_operand.hbm [shape: f32[2,1,16,16], index: 1, kind: input, shape index: {}]   ;;  %s1287_s2 = inlined_call_operand.hbm [shape: f32[2,1,16,16], index: 2, kind: input, shape index: {}]   ;;  %s1288_s3 = inlined_call_operand.hbm [shape: f32[2,2,16,16], index: 3, kind: input, shape index: {}]   ;;  %s1289_s4 = inlined_call_operand.hbm [shape: f32[2,2,16,16], index: 4, kind: input, shape index: {}]   ;;  %s1290_s5 = inlined_call_operand.hbm [shape: f32[1], index: 5, kind: output, shape index: {}]  }
   0x1   :  { %1296 = sst [smem:[#allocation20_spill]] %s1286_s1  ;;  %s725_s20 = scalar_lea.hbm %s1285_s0, 16 }
   0x2   :  { %p726_p0 = scmp.ne.s32.totalorder %s1285_s0, %s725_s20  ;;  %p729_p1 = scmp.lt.u32.totalorder %s725_s20, %s1285_s0 }
   0x4   :  { %p731_p2 = pnand %p729_p1, %p726_p0 }
   0x6   :  { %734 = shalt.err (!%p731_p2)  }
   0x7   :  { %s933_s25 = smov [#allocation5]  }
   0x8   :  { %11 = dma.hbm_to_smem %s1285_s0, 16, %s933_s25, [#allocation4] }
   0x9   :  { %891 = dma.done.wait [#allocation4], 16 }
   0xa   :  { %892 = vsyncadd [#allocation4], 4294967280 }
   0xb   :  { %13 = sfence }
   0xc   :  { %14 = vsyncpa [#allocation7], 0 }
   0xd   :  { %16 = vsyncpa [#allocation7 + $0x1], 0 }
   0xe   :  { %17 = vsyncpa [#allocation10], 0 }
   0xf   :  { %19 = vsyncpa [#allocation10 + $0x1], 0 }
  0x10   :  { %20 = vsyncpa [#allocation13], 0 }
  0x11   :  { %22 = vsyncpa [#allocation13 + $0x1], 0 }
  0x12   :  { %23 = vsyncpa [#allocation8], 0  ;;  %s984_s28 = smov 0   ;;  %s986_s29 = smov 0  }
  0x13   :  { %s988_s30 = smov 0   ;;  %s990_s6 = smov 0  }
  0x14   :  { %s992_s7 = smov 0   ;;  %s994_s0 = smov 0  }
  0x15 LB: > { %s1013_s8 = sadd.s32 4294967295, %s931_s0   ;;  %s41_s9 = sadd.s32 1, %s927_s7  ;;  %s931_s0 = sphi %s994_s0, %s29_s0   ;;  %s927_s7 = sphi %s992_s7, %s1311_s7   ;;  %s923_s6 = sphi %s990_s6, %s1310_s6   ;;  %s919_s30 = sphi %s988_s30, %s1309_s30   ;;  %s915_s29 = sphi %s986_s29, %s1308_s29   ;;  %s911_s28 = sphi %s984_s28, %s1307_s28  }
  0x16   : > { %p43_p3 = scmp.ge.s32.totalorder %s41_s9, 2  ;;  %s50_s10 = sadd.s32 1, %s919_s30 }
  0x17   : > { %p57_p4 = scmp.ne.s32.totalorder %s919_s30, %s915_s29  ;;  %p58_p5 = scmp.eq.s32.totalorder %s931_s0, 0 }
  0x18   : > { %s1313_s9 = smov (%p43_p3, %s41_s9), 0  ;;  %p63_p7 = scmp.ne.s32.totalorder %s915_s29, %s911_s28 }
  0x19   : > { %p59_p6 = por %p58_p5, %p57_p4  ;;  %s45_s11 = ssub.s32 %s927_s7, %s1313_s9 }
  0x1a   : > { %p64_p8 = scmp.eq.s32.totalorder %s1013_s8, 0  ;;  %p48_p9 = scmp.eq.s32.totalorder %s45_s11, 0 }
  0x1b   : > { %p669_p11 = scmp.lt.s32.totalorder %s931_s0, 2  ;;  %s1035_s14 = sand.u32 1, %s919_s30  }
  0x1c   : > { %p1026_p10 = por %p64_p8, %p63_p7  ;;  %s634_s15 = sshll.u32 %s927_s7, 8 }
  0x1d   : > { %s1032_s13 = scalar_select %p48_p9, %s919_s30, %s50_s10  }
  0x1e   : > { %s1297_s12 = scalar_select %p1026_p10, 1, 0 }
  0x1f   : > { %s610_s16 = sshll.u32 %s1035_s14, 4  ;;  %p1039_p12 = pnand %p669_p11, %p59_p6 }
  0x20   : > { %s215_s18 = sand.u32 1, %s931_s0   ;;  %s1049_s21 = scalar_lea.hbm %s1287_s2, %s634_s15 }
  0x21   : > { %s219_s22 = scalar_lea.vmem [#allocation9], %s610_s16  ;;  %s1056_s24 = scalar_lea.sflag [#allocation10], %s215_s18 }
  0x22   : > { %s228_s23 = sshll.u32 %s219_s22, 4  ;;  %s735_s25 = scalar_lea.hbm %s1049_s21, 256  ;;  %s1053_s23 = int_to_ptr.vmem [resolvable:$true] %s228_s23 }
  0x23   : > { %p736_p0 = scmp.ne.s32.totalorder %s1049_s21, %s735_s25  ;;  %p1062_p1 = pneg %p1039_p12 }
  0x24   : > { %s740_s10 = scalar_lea.hbm %s1287_s2, 512  ;;  %p741_p4 = scmp.lt.u32.totalorder %s1049_s21, %s1287_s2 }
  0x25   : > { %p738_p2 = pnand %p1062_p1, %p736_p0  ;;  %p742_p5 = scmp.lt.u32.totalorder %s740_s10, %s735_s25 }
  0x26   : > { %p744_p7 = scmp.lt.u32.totalorder %s735_s25, %s1049_s21 }
  0x27   : > { %p739_p3 = pneg %p738_p2  ;;  %p743_p6 = por %p742_p5, %p741_p4 }
  0x29   : > { %p745_p8 = por %p744_p7, %p743_p6 }
  0x2b   : > { %p746_p9 = pnand %p745_p8, %p739_p3 }
  0x2d   : > { %749 = shalt.err (!%p746_p9)
}
  0x2e   : > { %s750_s18 = scalar_lea.vmem %s1053_s23, 256  ;;  %s934_s20 = smov [#allocation9]  }
  0x2f   : > { %p751_p11 = scmp.ne.s32.totalorder %s1053_s23, %s750_s18  ;;  %s755_s22 = sshll.u32 %s934_s20, 4  ;;  %s756_s22 = int_to_ptr.vmem [resolvable:$false] %s755_s22 }
  0x30   : > { %s757_s27 = scalar_lea.vmem %s756_s22, 512  ;;  %p758_p13 = scmp.lt.s32.totalorder %s1053_s23, %s756_s22 }
  0x31   : > { %p753_p0 = pnand %p751_p11, %p1062_p1  ;;  %p759_p10 = scmp.lt.s32.totalorder %s757_s27, %s750_s18 }
  0x33   : > { %p754_p2 = pneg %p753_p0  ;;  %p760_p4 = por %p759_p10, %p758_p13 }
  0x35   : > { %p761_p5 = pnand %p760_p4, %p754_p2 }
  0x37   : > { %764 = shalt.err (!%p761_p5)
}
  0x38   : > { %s1292_s25 = smov 128   ;;  %s1294_s28 = smov 8  }
  0x39   : > { %662 = dma.hbm_to_vmem [thread:$0]  (!%p1039_p12), %s1049_s21, 256, %s1053_s23, %s1056_s24, %s1292_s25, %s1292_s25, %s1294_s28  }
  0x3a   : > { %p282_p10 = scmp.lt.s32.totalorder %s931_s0, 3  ;;  %p1300_p13 = scmp.ge.s32.totalorder %s931_s0, 1 }
  0x3b   : > { %s1302_s1 = sld [smem:[#allocation20_spill]]  ;;  %s196_s20 = scalar_lea.vmem [#allocation6], %s610_s16 }
  0x3c   : > { %p1092_p3 = pnand %p1300_p13, %p282_p10  ;;  %s205_s22 = sshll.u32 %s196_s20, 4  ;;  %s1105_s22 = int_to_ptr.vmem [resolvable:$true] %s205_s22 }
  0x3d   : > { %s616_s21 = sshll.u32 %s1035_s14, 5  ;;  %s193_s23 = scalar_lea.sflag [#allocation7], %s1035_s14 }
  0x3e   : > { %s1301_s10 = scalar_select %p1092_p3, 1, 0 }
  0x41   : > { %s1101_s18 = scalar_lea.hbm %s1302_s1, %s634_s15  ;;  %s770_s15 = scalar_lea.hbm %s1302_s1, 512 }
  0x42   : > { %s765_s27 = scalar_lea.hbm %s1101_s18, 256  ;;  %p771_p9 = scmp.lt.u32.totalorder %s1101_s18, %s1302_s1 }
  0x43   : > { %p766_p6 = scmp.ne.s32.totalorder %s1101_s18, %s765_s27  ;;  %p772_p11 = scmp.lt.u32.totalorder %s770_s15, %s765_s27 }
  0x44   : > { %p774_p2 = scmp.lt.u32.totalorder %s765_s27, %s1101_s18 }
  0x45   : > { %p768_p7 = pnand %p766_p6, %p1062_p1  ;;  %p773_p0 = por %p772_p11, %p771_p9 }
  0x47   : > { %p769_p8 = pneg %p768_p7  ;;  %p775_p4 = por %p774_p2, %p773_p0 }
  0x49   : > { %p776_p5 = pnand %p775_p4, %p769_p8 }
  0x4b   : > { %779 = shalt.err (!%p776_p5)
}
  0x4c   : > { %s780_s16 = scalar_lea.vmem %s1105_s22, 256  ;;  %s937_s25 = smov [#allocation6]  }
  0x4d   : > { %p781_p10 = scmp.ne.s32.totalorder %s1105_s22, %s780_s16  ;;  %s785_s20 = sshll.u32 %s937_s25, 4  ;;  %s786_s20 = int_to_ptr.vmem [resolvable:$false] %s785_s20 }
  0x4e   : > { %s787_s28 = scalar_lea.vmem %s786_s20, 512  ;;  %p788_p7 = scmp.lt.s32.totalorder %s1105_s22, %s786_s20 }
  0x4f   : > { %p783_p13 = pnand %p781_p10, %p1062_p1  ;;  %p789_p3 = scmp.lt.s32.totalorder %s787_s28, %s780_s16 }
  0x51   : > { %p784_p6 = pneg %p783_p13  ;;  %p790_p9 = por %p789_p3, %p788_p7 }
  0x53   : > { %p791_p11 = pnand %p790_p9, %p784_p6 }
  0x55   : > { %794 = shalt.err (!%p791_p11)
}
  0x56   : > { %s1303_s27 = smov 8   ;;  %s1304_s11 = smov 128  }
  0x57   : > { %659 = dma.hbm_to_vmem [thread:$0]  (!%p1039_p12), %s1101_s18, 256, %s1105_s22, %s193_s23, %s1304_s11, %s1304_s11, %s1303_s27  }
  0x58   : > { %s636_s15 = sshll.u32 %s927_s7, 9  ;;  %s242_s20 = scalar_lea.vmem [#allocation11], %s616_s21 }
  0x59   : > { %s1141_s25 = scalar_lea.hbm %s1288_s3, %s636_s15  ;;  %s251_s28 = sshll.u32 %s242_s20, 4  ;;  %s1145_s28 = int_to_ptr.vmem [resolvable:$true] %s251_s28 }
  0x5a   : > { %s795_s1 = scalar_lea.hbm %s1141_s25, 512  ;;  %s800_s23 = scalar_lea.hbm %s1288_s3, 1024 }
  0x5b   : > { %p796_p3 = scmp.ne.s32.totalorder %s1141_s25, %s795_s1  ;;  %p801_p2 = scmp.lt.u32.totalorder %s1141_s25, %s1288_s3 }
  0x5c   : > { %p802_p4 = scmp.lt.u32.totalorder %s800_s23, %s795_s1  ;;  %p804_p10 = scmp.lt.u32.totalorder %s795_s1, %s1141_s25 }
  0x5d   : > { %p798_p8 = pnand %p796_p3, %p1062_p1 }
  0x5e   : > { %p803_p5 = por %p802_p4, %p801_p2 }
  0x5f   : > { %p799_p0 = pneg %p798_p8 }
  0x60   : > { %p805_p13 = por %p804_p10, %p803_p5 }
  0x62   : > { %p806_p6 = pnand %p805_p13, %p799_p0 }
  0x64   : > { %809 = shalt.err (!%p806_p6)
}
  0x65   : > { %s810_s20 = scalar_lea.vmem %s1145_s28, 512  ;;  %s938_s18 = smov [#allocation11]  }
  0x66   : > { %p811_p7 = scmp.ne.s32.totalorder %s1145_s28, %s810_s20  ;;  %s815_s22 = sshll.u32 %s938_s18, 4  ;;  %s816_s22 = int_to_ptr.vmem [resolvable:$false] %s815_s22 }
  0x67   : > { %s817_s19 = scalar_lea.vmem %s816_s22, 1024  ;;  %p818_p3 = scmp.lt.s32.totalorder %s1145_s28, %s816_s22 }
  0x68   : > { %p813_p9 = pnand %p811_p7, %p1062_p1  ;;  %p819_p8 = scmp.lt.s32.totalorder %s817_s19, %s810_s20 }
  0x6a   : > { %p814_p11 = pneg %p813_p9  ;;  %p820_p2 = por %p819_p8, %p818_p3 }
  0x6c   : > { %p821_p4 = pnand %p820_p2, %p814_p11 }
  0x6e   : > { %824 = shalt.err (!%p821_p4)
}
  0x6f   : > { %665 = dma.hbm_to_vmem [thread:$0]  (!%p1039_p12), %s1141_s25, 512, %s1145_s28, %s1056_s24, %s1304_s11, %s1304_s11, %s1303_s27  }
  0x70   : > { %s1177_s16 = scalar_lea.hbm %s1289_s4, %s636_s15  ;;  %s265_s20 = scalar_lea.vmem [#allocation12], %s616_s21 }
  0x71   : > { %s274_s18 = sshll.u32 %s265_s20, 4  ;;  %s262_s22 = scalar_lea.sflag [#allocation13], %s1035_s14  ;;  %s1181_s18 = int_to_ptr.vmem [resolvable:$true] %s274_s18 }
  0x72   : > { %s825_s19 = scalar_lea.hbm %s1177_s16, 512  ;;  %s830_s15 = scalar_lea.hbm %s1289_s4, 1024 }
  0x73   : > { %p826_p0 = scmp.ne.s32.totalorder %s1177_s16, %s825_s19  ;;  %p831_p13 = scmp.lt.u32.totalorder %s1177_s16, %s1289_s4 }
  0x74   : > { %p832_p6 = scmp.lt.u32.totalorder %s830_s15, %s825_s19  ;;  %p834_p9 = scmp.lt.u32.totalorder %s825_s19, %s1177_s16 }
  0x75   : > { %p828_p5 = pnand %p826_p0, %p1062_p1 }
  0x76   : > { %p833_p7 = por %p832_p6, %p831_p13 }
  0x77   : > { %p829_p10 = pneg %p828_p5 }
  0x78   : > { %p835_p11 = por %p834_p9, %p833_p7 }
  0x7a   : > { %p836_p3 = pnand %p835_p11, %p829_p10 }
  0x7c   : > { %839 = shalt.err (!%p836_p3)
}
  0x7d   : > { %s840_s21 = scalar_lea.vmem %s1181_s18, 512  ;;  %s939_s23 = smov [#allocation12]  }
  0x7e   : > { %p841_p8 = scmp.ne.s32.totalorder %s1181_s18, %s840_s21  ;;  %s845_s20 = sshll.u32 %s939_s23, 4  ;;  %s846_s20 = int_to_ptr.vmem [resolvable:$false] %s845_s20 }
  0x7f   : > { %s847_s24 = scalar_lea.vmem %s846_s20, 1024  ;;  %p848_p0 = scmp.lt.s32.totalorder %s1181_s18, %s846_s20 }
  0x80   : > { %p843_p2 = pnand %p841_p8, %p1062_p1  ;;  %p849_p5 = scmp.lt.s32.totalorder %s847_s24, %s840_s21 }
  0x82   : > { %p844_p4 = pneg %p843_p2  ;;  %p850_p13 = por %p849_p5, %p848_p0 }
  0x84   : > { %p851_p6 = pnand %p850_p13, %p844_p4 }
  0x86   : > { %854 = shalt.err (!%p851_p6)
}
  0x87   : > { %668 = dma.hbm_to_vmem [thread:$0]  (!%p1039_p12), %s1177_s16, 512, %s1181_s18, %s262_s22, %s1304_s11, %s1304_s11, %s1303_s27  }
  0x88   : > { %p1305_p1 = scmp.ne.s32.totalorder %s1301_s10, 0 }
  0x89   : > { %s288_s26 = sand.u32 (!%p1305_p1), 1, %s915_s29   ;;  %p1306_p10 = scmp.ne.s32.totalorder (!%p1305_p1), %s1297_s12, 0 }
  0x8a   : > { %286 = sbr.rel (%p1305_p1) target bundleno = 412 (0x19c), region = 36  ;;  %s623_s19 = sshll.u32 (!%p1305_p1), %s288_s26, 4 }
  0x8b   : > { %s289_s25 = scalar_lea.sflag (!%p1305_p1), [#allocation7], %s288_s26  ;;  %s292_s15 = scalar_lea.vmem (!%p1305_p1), [#allocation6], %s623_s19 }
  0x91   : > { %894 = dma.done.wait (%p1306_p10), %s289_s25, 256  }
  0x92   : > { %896 = vsyncadd (%p1306_p10), %s289_s25, 4294967040  ;;  %s297_s14 = sand.u32 1, %s1013_s8   ;;  %s301_s28 = scalar_lea.vmem [#allocation9], %s623_s19 }
  0x93   : > { %s298_s17 = scalar_lea.sflag [#allocation10], %s297_s14 }
  0x94   : > { %898 = dma.done.wait (%p1306_p10), %s298_s17, 768  }
  0x95   : > { %900 = vsyncadd (%p1306_p10), %s298_s17, 4294966528  ;;  %s625_s10 = sshll.u32 %s288_s26, 5  ;;  %s316_s11 = scalar_lea.sflag [#allocation13], %s288_s26 }
  0x96   : > { %s1222_s27 = scalar_lea.vmem [#allocation11], %s625_s10  ;;  %s1224_s16 = scalar_lea.vmem [#allocation12], %s625_s10 }
  0x97   : > { %902 = dma.done.wait (%p1306_p10), %s316_s11, 512  }
  0x98   : > { %904 = vsyncadd (%p1306_p10), %s316_s11, 4294966784  ;;  %p358_p12 = scmp.eq.s32.totalorder %s923_s6, 1  ;;  %p362_p7 = scmp.eq.s32.totalorder %s923_s6, 0 }
  0x99   : > { %vm367_vm0 = vcmask (%p362_p7), 130048   ;;  %v940_v0 = vmov (%p362_p7), 0.0  }
  0x9a   : > { %366 = sbr.rel (!%p362_p7) target bundleno = 161 (0xa1), region = 56  ;;  %368 = vst.msk [vmem:[#allocation2] sm:$0xff] (%p362_p7), %vm367_vm0, %v940_v0  ;;  %369 = vst.msk [vmem:[#allocation2 + $0x8] sm:$0xff] (%p362_p7), %vm367_vm0, %v940_v0 }
  0x9b   : > { %370 = vst.msk [vmem:[#allocation3] sm:$0xff] (%p362_p7), %vm367_vm0, %v940_v0  ;;  %371 = vst.msk [vmem:[#allocation3 + $0x8] sm:$0xff] (%p362_p7), %vm367_vm0, %v940_v0 }
  0x9c   : > { %372 = vst.msk [vmem:[#allocation3 + $0x10] sm:$0xff] (%p362_p7), %vm367_vm0, %v940_v0  ;;  %373 = vst.msk [vmem:[#allocation3 + $0x18] sm:$0xff] (%p362_p7), %vm367_vm0, %v940_v0 }
  0xa1 PF: > { %v374_v1 = vld [vmem:[%s292_s15] sm:$0xff]  ;;  %v375_v4 = vld [vmem:[%s292_s15 + $0x8] sm:$0xff]  ;;  %vm402_vm1 = vcmask 130048   ;;  %s453_s6 = sld [smem:[#allocation5]] (%p358_p12)  ;;  %s629_s12 = sld [smem:[#allocation5 + $0x1]] (%p358_p12) }
  0xa2   : > { %v376_v2 = vld [vmem:[%s301_s28] sm:$0xff]  ;;  %v377_v5 = vld [vmem:[%s301_s28 + $0x8] sm:$0xff] }
  0xa3   : > { %v378_v3 = vsub.f32 %v374_v1, %v376_v2  ;;  %v398_v6 = vld [vmem:[#allocation2] sm:$0xff]  ;;  %v379_v7 = vsub.f32 %v375_v4, %v377_v5  ;;  %v380_v8 = vld [vmem:[%s1222_s27] sm:$0xff]  ;;  %v399_v11 = vld [vmem:[#allocation2 + $0x8] sm:$0xff] }
  0xa4   : > { %v384_v9 = vld [vmem:[%s1224_s16] sm:$0xff]  ;;  %v381_v13 = vld [vmem:[%s1222_s27 + $0x8] sm:$0xff]  ;;  %v382_v18 = vld [vmem:[%s1222_s27 + $0x10] sm:$0xff] }
  0xa5   : > { %v392_v10 = vmul.f32 %v378_v3, %v378_v3  ;;  %v388_v12 = vsub.f32 %v380_v8, %v384_v9  ;;  %v385_v14 = vld [vmem:[%s1224_s16 + $0x8] sm:$0xff]  ;;  %v393_v15 = vmul.f32 %v379_v7, %v379_v7  ;;  %v405_v16 = vld [vmem:[#allocation3] sm:$0xff]  ;;  %v386_v19 = vld [vmem:[%s1224_s16 + $0x10] sm:$0xff] }
  0xa6   : > { %v389_v17 = vsub.f32 %v381_v13, %v385_v14  ;;  %v406_v22 = vld [vmem:[#allocation3 + $0x8] sm:$0xff]  ;;  %v390_v23 = vsub.f32 %v382_v18, %v386_v19  ;;  %v383_v24 = vld [vmem:[%s1222_s27 + $0x18] sm:$0xff]  ;;  %v407_v28 = vld [vmem:[#allocation3 + $0x10] sm:$0xff] }
  0xa7   : > { %v400_v20 = vadd.f32 %v398_v6, %v392_v10  ;;  %v394_v21 = vand.u32 2147483647, %v388_v12  ;;  %v387_v25 = vld [vmem:[%s1224_s16 + $0x18] sm:$0xff]  ;;  %v401_v26 = vadd.f32 %v399_v11, %v393_v15  ;;  %p454_p9 = scmp.gt.s32.totalorder (%p358_p12), %s453_s6, 0  ;;  %p458_p11 = scmp.gt.s32.totalorder (%p358_p12), %s629_s12, 0 }
  0xa8   : > { %v395_v27 = vand.u32 2147483647, %v389_v17  ;;  %v391_v29 = vsub.f32 %v383_v24, %v387_v25  ;;  %v396_v31 = vand.u32 2147483647, %v390_v23  ;;  %v408_v32 = vld [vmem:[#allocation3 + $0x18] sm:$0xff]  ;;  %418 = sbr.rel (!%p358_p12) target bundleno = 397 (0x18d), region = 60 }
  0xa9   : > { %403 = vst.msk [vmem:[#allocation2] sm:$0xff] %vm402_vm1, %v400_v20  ;;  %v409_v30 = vadd.f32 %v405_v16, %v394_v21  ;;  %404 = vst.msk [vmem:[#allocation2 + $0x8] sm:$0xff] %vm402_vm1, %v401_v26 }
  0xaa   : > { %v410_v33 = vadd.f32 %v406_v22, %v395_v27  ;;  %v397_v34 = vand.u32 2147483647, %v391_v29  ;;  %v411_v35 = vadd.f32 %v407_v28, %v396_v31 }
  0xab   : > { %413 = vst.msk [vmem:[#allocation3] sm:$0xff] %vm402_vm1, %v409_v30 }
  0xac   : > { %414 = vst.msk [vmem:[#allocation3 + $0x8] sm:$0xff] %vm402_vm1, %v410_v33  ;;  %v412_v36 = vadd.f32 %v408_v32, %v397_v34  ;;  %415 = vst.msk [vmem:[#allocation3 + $0x10] sm:$0xff] %vm402_vm1, %v411_v35 }
  0xae   : > { %416 = vst.msk [vmem:[#allocation3 + $0x18] sm:$0xff] %vm402_vm1, %v412_v36 }
  0xb0   : > { %v419_v37 = vld [vmem:[#allocation2] sm:$0xff]  ;;  %v420_v38 = vld [vmem:[#allocation2 + $0x8] sm:$0xff] }
  0xb1   : > { %v421_v40 = vsel %vm402_vm1, %v419_v37, 0.0  ;;  %v422_v41 = vsel %vm402_vm1, %v420_v38, 0.0 }
  0xb2   : > { %v433_v39 = vld [vmem:[#allocation3] sm:$0xff]  ;;  %v423_v46 = vadd.f32 %v422_v41, %v421_v40 }
  0xb3   : > { %v434_v42 = vld [vmem:[#allocation3 + $0x8] sm:$0xff]  ;;  %v435_v43 = vld [vmem:[#allocation3 + $0x10] sm:$0xff]  ;;  %v437_v45 = vsel %vm402_vm1, %v433_v39, 0.0 }
  0xb4   : > { %v438_v47 = vsel %vm402_vm1, %v434_v42, 0.0  ;;  %v440_v48 = vsel %vm402_vm1, %v435_v43, 0.0  ;;  %424 = vadd.xlane.f32.xlu0 %v423_v46 }
  0xb5   : > { %v436_v44 = vld [vmem:[#allocation3 + $0x18] sm:$0xff]  ;;  %v439_v49 = vadd.f32 %v438_v47, %v437_v45 }
  0xb6   : > { %v442_v50 = vsel %vm402_vm1, %v436_v44, 0.0 }
  0xb7   : > { %v441_v51 = vadd.f32 %v440_v48, %v439_v49 }
  0xb9   : > { %v443_v52 = vadd.f32 %v442_v50, %v441_v51 }
  0xbb   : > { %444 = vadd.xlane.f32.xlu0 %v443_v52 }
 0x141   : > { %v425_v53 = vpop.xlane.xlu0 %424 }
 0x142   : > { %v426_v54 = vrot.slane %v425_v53, 4 }
 0x144   : > { %v427_v55 = vadd.f32 %v426_v54, %v425_v53 }
 0x146   : > { %v428_v56 = vrot.slane %v427_v55, 2 }
 0x148   : > { %v445_v57 = vpop.xlane.xlu0 %444  ;;  %v429_v59 = vadd.f32 %v428_v56, %v427_v55 }
 0x149   : > { %v446_v58 = vrot.slane %v445_v57, 4 }
 0x14a   : > { %v430_v61 = vrot.slane %v429_v59, 1 }
 0x14b   : > { %v447_v60 = vadd.f32 %v446_v58, %v445_v57 }
 0x14c   : > { %v431_v63 = vadd.f32 %v430_v61, %v429_v59 }
 0x14d   : > { %v448_v62 = vrot.slane %v447_v60, 2 }
 0x14e   : > { %640 = vpush %v431_v63 }
 0x14f   : > { %v449_v0 = vadd.f32 %v448_v62, %v447_v60 }
 0x151   : > { %v450_v1 = vrot.slane %v449_v0, 1 }
 0x153   : > { %v451_v2 = vadd.f32 %v450_v1, %v449_v0 }
 0x155   : > { %642 = vpush %v451_v2 }
 0x17f   : > { %s641_s18 = spop %640 }
 0x180   : > { %s455_s22 = smul.f32 0.390625, %s641_s18 }
 0x182   : > { %s1315_s22 = smov (!%p454_p9, %s455_s22), 0.0 }
 0x186   : > { %s643_s1 = spop %642 }
 0x187   : > { %s459_s21 = smul.f32 9.765625e-05, %s643_s1 }
 0x189   : > { %s1317_s21 = smov (!%p458_p11, %s459_s21), 0.0 }
 0x18a   : > { %s461_s23 = sadd.f32 %s1317_s21, %s1315_s22 }
 0x18c   : > { %463 = sst [smem:[#allocation14]] %s461_s23 }
 0x18d PF: > { %p670_p3 = scmp.eq.s32.totalorder %s1013_s8, 1  ;;  %s855_s26 = scalar_lea.hbm %s1290_s5, 16 }
 0x18e   : > { %p856_p8 = scmp.ne.s32.totalorder %s1290_s5, %s855_s26  ;;  %p861_p0 = scmp.lt.u32.totalorder %s855_s26, %s1290_s5 }
 0x190   : > { %p857_p2 = pnand %p856_p8, %p670_p3 }
 0x192   : > { %p858_p4 = pneg %p857_p2 }
 0x194   : > { %p863_p5 = pnand %p861_p0, %p858_p4 }
 0x196   : > { %866 = shalt.err (!%p863_p5)
}
 0x197   : > { %s941_s17 = smov [#allocation14]  }
 0x198   : > { %653 = dma.smem_to_hbm (%p670_p3), %s941_s17, 16, %s1290_s5, [#allocation8]  }
 0x199   : > { %906 = dma.done.wait (%p670_p3), [#allocation8], 16  }
 0x19a   : > { %908 = vsyncadd (%p670_p3), [#allocation8], 4294967280 }
 0x19b   : > { %477 = sfence }
 0x19c PF: > { %s29_s0 = sadd.s32 1, %s931_s0   ;;  %s1307_s28 = smov %s915_s29 }
 0x19d   : > { %p26_p13 = scmp.ge.s32.totalorder %s29_s0, 4   ;;  %s1308_s29 = smov %s919_s30 }
 0x19e   : > { %s1309_s30 = smov %s1032_s13  ;;  %s1310_s6 = smov %s927_s7 }
 0x19f   : > { %s1311_s7 = smov %s1313_s9  ;;  %28 = sbr.rel (!%p26_p13) target bundleno = 21 (0x15), region = 119 }
 0x1a6   :  { %483 = vsyncpa [#allocation7], 1 }
 0x1a7   :  { %485 = vsyncpa [#allocation7 + $0x1], 1 }
 0x1a8   :  { %486 = vsyncpa [#allocation10], 1 }
 0x1a9   :  { %488 = vsyncpa [#allocation10 + $0x1], 1 }
 0x1aa   :  { %489 = vsyncpa [#allocation13], 1 }
 0x1ab   :  { %491 = vsyncpa [#allocation13 + $0x1], 1 }
 0x1ac   :  { %492 = vsyncpa [#allocation8], 1 }
 0x1ad   :  { %494 = vsyncpa [#allocation8 + $0x1], 1 }

</bundles_post_ra>
